<compile_context>
chip_gen: v7x
topology: tpu7x:2x2x1
jax: 0.10.0
libtpu: 0.0.40
codegen_flags: <defaults>
</compile_context>

<pallas_src>
import functools
import math

import jax
import jax.numpy as jnp
import numpy as np
from jax.experimental import pallas as pl
from jax.experimental.pallas import tpu as pltpu


def _round_up(x, m):
    return ((x + m - 1) // m) * m


def _cascade_biquads(a1s, a2s):
    """Multiply the biquad polynomials (1 + a1_k z^-1 + a2_k z^-2) over sections.

    a1s/a2s: lists of same-shaped arrays (one per section).
    Returns the list of coefficients of z^-1 .. z^-(2S) of the product
    (the leading 1 is kept implicit and dropped). Pure jnp; works both on
    (1, TM) rows inside the kernel and on (B, T) arrays in the reference.
    """
    poly = []  # poly[j-1] = coeff of z^-j ; z^0 coeff implicitly 1
    for a1, a2 in zip(a1s, a2s):
        deg = len(poly)
        new = []
        for j in range(1, deg + 3):
            term = None
            if j <= deg:                       # 1 * old_coeff[j]
                term = poly[j - 1]
            if j - 1 <= deg:                   # a1 * old_coeff[j-1]
                c = a1 if j - 1 == 0 else a1 * poly[j - 2]
                term = c if term is None else term + c
            if 0 <= j - 2 <= deg:              # a2 * old_coeff[j-2]
                c = a2 if j - 2 == 0 else a2 * poly[j - 3]
                term = c if term is None else term + c
            new.append(term)
        poly = new
    return poly


def _glottal_enc_kernel(h_ref, w_ref, b_ref, out_ref, *,
                        voice_order, noise_order, table_hidden,
                        max_abs, log_f0_min, log_f0_max, use_snr):
    """One (TM, F) row tile -> one (OUT_C, TM) lane-dense output slab."""
    # Channel-major matmul on the MXU: W (C, F) x h_tile (TM, F) contracting on F
    # -> y (C, TM) f32.  N = TM, and the epilogue below is lane-dense (lane = row).
    y = jax.lax.dot_general(
        w_ref[...], h_ref[...],
        dimension_numbers=(((1,), (1,)), ((), ())),
        preferred_element_type=jnp.float32)
    y = y + b_ref[...]                                   # (C, 1) broadcast over TM

    # channel-row layout of y (learn_voicing=False)
    c_v = 1
    c_vg = 1 + voice_order
    c_n = 2 + voice_order
    c_ng = 2 + voice_order + noise_order
    c_h = 3 + voice_order + noise_order

    # f0 = exp(sigmoid(logit) * (lmax - lmin) + lmin)            -- (1, TM)
    f0 = jnp.exp(jax.nn.sigmoid(y[0:1, :]) * (log_f0_max - log_f0_min)
                 + log_f0_min)

    v_log_gain = y[c_vg:c_vg + 1, :]
    n_log_gain = y[c_ng:c_ng + 1, :]
    if use_snr:
        n_log_gain = v_log_gain - 0.5 * n_log_gain
    v_gain = jnp.exp(v_log_gain)
    n_gain = jnp.exp(n_log_gain)

    def lpc_rows(start, order):
        if order == 0:
            return []
        block = y[start:start + order, :]                # (order, TM)
        sig = jax.nn.sigmoid(block) * max_abs            # one EUP pass / block
        tnh = jnp.tanh(block)                            # one EUP pass / block
        a1s, a2s = [], []
        for k in range(order // 2):
            mag = sig[2 * k:2 * k + 1, :]                # (1, TM)
            cosv = tnh[2 * k + 1:2 * k + 2, :]           # (1, TM)
            a1s.append(-2.0 * mag * cosv)
            a2s.append(mag * mag)
        return _cascade_biquads(a1s, a2s)                # list of (1, TM)

    vcoeffs = lpc_rows(c_v, voice_order)
    ncoeffs = lpc_rows(c_n, noise_order)

    # ---- single consolidated output slab, one lane-dense row store each ----
    out_ref[0:1, :] = f0.astype(out_ref.dtype)
    out_ref[1:2, :] = v_gain.astype(out_ref.dtype)
    out_ref[2:3, :] = n_gain.astype(out_ref.dtype)
    for j, c in enumerate(vcoeffs):
        out_ref[3 + j:4 + j, :] = c.astype(out_ref.dtype)
    off = 3 + voice_order
    for j, c in enumerate(ncoeffs):
        out_ref[off + j:off + j + 1, :] = c.astype(out_ref.dtype)
    if table_hidden > 0:
        out_ref[3 + voice_order + noise_order:, :] = y[c_h:, :].astype(out_ref.dtype)


def glottal_enc_forward(h, weight, bias, *, voice_lpc_order, noise_lpc_order,
                        table_weight_hidden_size, f0_min=80.0, f0_max=1000.0,
                        max_abs_value=0.99, use_snr=False, tile_m=1024):
    """h: (B, T, F) f32. weight: (C, F) (PyTorch layout). bias: (C,)."""
    B, T, F = h.shape
    Vo, No, Ht = voice_lpc_order, noise_lpc_order, table_weight_hidden_size
    assert Vo % 2 == 0 and No % 2 == 0
    C = 1 + Vo + 1 + No + 1 + Ht
    assert weight.shape == (C, F) and bias.shape == (C,)
    OUT_C = 3 + Vo + No + Ht                 # f0 | vgain | ngain | vlpc | nlpc | htab

    M = B * T
    if M <= tile_m:
        tm = M                               # single tile: blocks equal full dims
    else:
        tm = _round_up(min(tile_m, M), 128)  # lane-aligned row tile; tail handled
    n_tiles = pl.cdiv(M, tm)                 # by Pallas partial-block masking

    h2d = h.reshape(M, F).astype(jnp.float32)      # no bf16 cast, no pad: one HBM pass
    w = weight.astype(jnp.float32)                 # (C, F), resident
    b2d = bias.reshape(C, 1).astype(jnp.float32)   # (C, 1), channel-major broadcast

    kernel = functools.partial(
        _glottal_enc_kernel,
        voice_order=Vo, noise_order=No, table_hidden=Ht,
        max_abs=max_abs_value,
        log_f0_min=math.log(f0_min), log_f0_max=math.log(f0_max),
        use_snr=use_snr)

    out = pl.pallas_call(
        kernel,
        out_shape=jax.ShapeDtypeStruct((OUT_C, M), jnp.float32),
        grid=(n_tiles,),
        in_specs=[
            pl.BlockSpec((tm, F), lambda i: (i, 0)),     # h row tile
            pl.BlockSpec((C, F), lambda i: (0, 0)),      # weight (resident)
            pl.BlockSpec((C, 1), lambda i: (0, 0)),      # bias (resident)
        ],
        out_specs=pl.BlockSpec((OUT_C, tm), lambda i: (0, i)),
        compiler_params=pltpu.CompilerParams(
            dimension_semantics=("parallel",)),
    )(h2d, w, b2d)

    # Layout plumbing back to the PyTorch output shapes (tiny tensors).
    f0 = out[0].reshape(B, T)
    voice_gain = out[1].reshape(B, T)
    noise_gain = out[2].reshape(B, T)
    voice_lpc = jnp.transpose(out[3:3 + Vo]).reshape(B, T, Vo)
    noise_lpc = jnp.transpose(out[3 + Vo:3 + Vo + No]).reshape(B, T, No)
    if Ht > 0:
        h_table = jnp.transpose(out[3 + Vo + No:]).reshape(B, T, Ht)
    else:
        h_table = jnp.zeros((B, T, 0), dtype=out.dtype)

    # Matches GlottalComplexConjLPCEncoder.forward:
    # (f0_params, (h,), (voice_gain, voice_lpc), (noise_gain, noise_lpc), ())
    return ([f0], (h_table,), (voice_gain, voice_lpc), (noise_gain, noise_lpc), ())


def _reference(h, weight, bias, *, voice_lpc_order, noise_lpc_order,
               table_weight_hidden_size, f0_min=80.0, f0_max=1000.0,
               max_abs_value=0.99, use_snr=False):
    Vo, No, Ht = voice_lpc_order, noise_lpc_order, table_weight_hidden_size
    y = jnp.einsum("btf,cf->btc", h, weight,
                   preferred_element_type=jnp.float32,
                   precision=jax.lax.Precision.HIGHEST) + bias.astype(jnp.float32)

    lmin, lmax = math.log(f0_min), math.log(f0_max)
    f0 = jnp.exp(jax.nn.sigmoid(y[..., 0]) * (lmax - lmin) + lmin)

    c_vg = 1 + Vo
    c_n = 2 + Vo
    c_ng = 2 + Vo + No
    c_h = 3 + Vo + No

    def biquads_to_lpc(logits):                 # logits: (B, T, S, 2)
        mag = jax.nn.sigmoid(logits[..., 0]) * max_abs_value
        cosv = jnp.tanh(logits[..., 1])
        a1 = -2.0 * mag * cosv
        a2 = mag * mag
        S = a1.shape[-1]
        coeffs = _cascade_biquads([a1[..., k] for k in range(S)],
                                  [a2[..., k] for k in range(S)])
        return jnp.stack(coeffs, axis=-1)

    vlogits = y[..., 1:1 + Vo].reshape(*y.shape[:-1], Vo // 2, 2)
    nlogits = y[..., c_n:c_n + No].reshape(*y.shape[:-1], No // 2, 2)
    voice_lpc = biquads_to_lpc(vlogits)
    noise_lpc = biquads_to_lpc(nlogits)

    voice_log_gain = y[..., c_vg]
    noise_log_gain = y[..., c_ng]
    if use_snr:
        noise_log_gain = voice_log_gain - 0.5 * noise_log_gain
    voice_gain = jnp.exp(voice_log_gain)
    noise_gain = jnp.exp(noise_log_gain)
    h_table = y[..., c_h:]
    return ([f0], (h_table,), (voice_gain, voice_lpc), (noise_gain, noise_lpc), ())


def _check(out, ref, tol):
    np.testing.assert_allclose(np.asarray(out[0][0]), np.asarray(ref[0][0]), **tol)  # f0
    np.testing.assert_allclose(np.asarray(out[1][0]), np.asarray(ref[1][0]), **tol)  # h table
    np.testing.assert_allclose(np.asarray(out[2][0]), np.asarray(ref[2][0]), **tol)  # voice gain
    np.testing.assert_allclose(np.asarray(out[2][1]), np.asarray(ref[2][1]), **tol)  # voice lpc
    np.testing.assert_allclose(np.asarray(out[3][0]), np.asarray(ref[3][0]), **tol)  # noise gain
    np.testing.assert_allclose(np.asarray(out[3][1]), np.asarray(ref[3][1]), **tol)  # noise lpc


if __name__ == "__main__":
    voice_lpc_order, noise_lpc_order = 4, 4
    table_weight_hidden_size = 8
    F = 32
    C = 1 + voice_lpc_order + 1 + noise_lpc_order + 1 + table_weight_hidden_size  # 19

    key = jax.random.PRNGKey(0)
    kh, kw, kb, kh2 = jax.random.split(key, 4)
    weight = jax.random.normal(kw, (C, F), dtype=jnp.float32) * 0.1
    bias = jax.random.normal(kb, (C,), dtype=jnp.float32) * 0.1

    kwargs = dict(voice_lpc_order=voice_lpc_order,
                  noise_lpc_order=noise_lpc_order,
                  table_weight_hidden_size=table_weight_hidden_size)
    tol = dict(rtol=2e-3, atol=2e-3)

    # Test 1: small shape, single tile (M = 100 rows, non-8/128-aligned full block).
    B, T = 2, 50
    h = jax.random.normal(kh, (B, T, F), dtype=jnp.float32)
    out = glottal_enc_forward(h, weight, bias, **kwargs)
    jax.block_until_ready(out)
    _check(out, _reference(h, weight, bias, **kwargs), tol)

    # Test 2: multi-tile grid with a partial tail block (M = 1400, tm = 1024),
    # also exercises the use_snr branch.
    B2, T2 = 2, 700
    h2 = jax.random.normal(kh2, (B2, T2, F), dtype=jnp.float32)
    out2 = glottal_enc_forward(h2, weight, bias, use_snr=True, **kwargs)
    jax.block_until_ready(out2)
    _check(out2, _reference(h2, weight, bias, use_snr=True, **kwargs), tol)

    print("KERNEL_OK")
</pallas_src>

<mosaic_0001>
module attributes {stable_mosaic.version = 11 : i64} {
  func.func @_glottal_enc_kernel(%arg0: i32, %arg1: memref<100x32xf32, #tpu.memory_space<vmem>>, %arg2: memref<19x32xf32, #tpu.memory_space<vmem>>, %arg3: memref<19x1xf32, #tpu.memory_space<vmem>>, %arg4: memref<19x100xf32, #tpu.memory_space<vmem>>) attributes {dimension_semantics = [#tpu.dimension_semantics<parallel>], iteration_bounds = array<i64: 1>, scalar_prefetch = 0 : i64, scratch_operands = 0 : i64, tpu.core_type = #tpu.core_type<tc>, window_params = [{transform_indices = @transform_0, window_bounds = array<i64: 100, 32>}, {pipeline_mode = #tpu.pipeline_mode<synchronous>, transform_indices = @transform_1, window_bounds = array<i64: 19, 32>}, {pipeline_mode = #tpu.pipeline_mode<synchronous>, transform_indices = @transform_2, window_bounds = array<i64: 19, 1>}, {transform_indices = @transform_3, window_bounds = array<i64: 19, 100>}]} {
    %c0 = arith.constant 0 : index
    %c0_0 = arith.constant 0 : index
    %0 = vector.load %arg2[%c0, %c0_0] : memref<19x32xf32, #tpu.memory_space<vmem>>, vector<19x32xf32>
    %c0_1 = arith.constant 0 : index
    %c0_2 = arith.constant 0 : index
    %1 = vector.load %arg1[%c0_1, %c0_2] : memref<100x32xf32, #tpu.memory_space<vmem>>, vector<100x32xf32>
    %cst = arith.constant dense<0.000000e+00> : vector<19x100xf32>
    %2 = tpu.matmul %0, %1, %cst {dimension_numbers = #tpu.dot_dimension_numbers<[1], [1], [0], [0], [0, 0, 1, 0], [], []>} : vector<19x32xf32>, vector<100x32xf32>, vector<19x100xf32> -> vector<19x100xf32>
    %c0_3 = arith.constant 0 : index
    %c0_4 = arith.constant 0 : index
    %3 = vector.load %arg3[%c0_3, %c0_4] : memref<19x1xf32, #tpu.memory_space<vmem>>, vector<19x1xf32>
    %4 = vector.broadcast %3 : vector<19x1xf32> to vector<19x100xf32>
    %5 = arith.addf %2, %4 : vector<19x100xf32>
    %6 = vector.extract_strided_slice %5 {offsets = [0, 0], sizes = [1, 100], strides = [1, 1]} : vector<19x100xf32> to vector<1x100xf32>
    %7 = arith.negf %6 : vector<1x100xf32>
    %8 = math.exp %7 : vector<1x100xf32>
    %cst_5 = arith.constant 1.000000e+00 : f32
    %9 = vector.broadcast %cst_5 : f32 to vector<1x100xf32>
    %10 = arith.addf %9, %8 : vector<1x100xf32>
    %11 = arith.divf %9, %10 : vector<1x100xf32>
    %cst_6 = arith.constant 2.5257287 : f32
    %12 = vector.broadcast %cst_6 : f32 to vector<1x100xf32>
    %13 = arith.mulf %11, %12 : vector<1x100xf32>
    %cst_7 = arith.constant 4.38202667 : f32
    %14 = vector.broadcast %cst_7 : f32 to vector<1x100xf32>
    %15 = arith.addf %13, %14 : vector<1x100xf32>
    %16 = math.exp %15 : vector<1x100xf32>
    %17 = vector.extract_strided_slice %5 {offsets = [5, 0], sizes = [1, 100], strides = [1, 1]} : vector<19x100xf32> to vector<1x100xf32>
    %18 = vector.extract_strided_slice %5 {offsets = [10, 0], sizes = [1, 100], strides = [1, 1]} : vector<19x100xf32> to vector<1x100xf32>
    %19 = math.exp %17 : vector<1x100xf32>
    %20 = math.exp %18 : vector<1x100xf32>
    %21 = vector.extract_strided_slice %5 {offsets = [1, 0], sizes = [4, 100], strides = [1, 1]} : vector<19x100xf32> to vector<4x100xf32>
    %22 = arith.negf %21 : vector<4x100xf32>
    %23 = math.exp %22 : vector<4x100xf32>
    %cst_8 = arith.constant 1.000000e+00 : f32
    %24 = vector.broadcast %cst_8 : f32 to vector<4x100xf32>
    %25 = arith.addf %24, %23 : vector<4x100xf32>
    %26 = arith.divf %24, %25 : vector<4x100xf32>
    %cst_9 = arith.constant 9.900000e-01 : f32
    %27 = vector.broadcast %cst_9 : f32 to vector<4x100xf32>
    %28 = arith.mulf %26, %27 : vector<4x100xf32>
    %29 = math.tanh %21 : vector<4x100xf32>
    %30 = vector.extract_strided_slice %28 {offsets = [0, 0], sizes = [1, 100], strides = [1, 1]} : vector<4x100xf32> to vector<1x100xf32>
    %31 = vector.extract_strided_slice %29 {offsets = [1, 0], sizes = [1, 100], strides = [1, 1]} : vector<4x100xf32> to vector<1x100xf32>
    %cst_10 = arith.constant -2.000000e+00 : f32
    %32 = vector.broadcast %cst_10 : f32 to vector<1x100xf32>
    %33 = arith.mulf %32, %30 : vector<1x100xf32>
    %34 = arith.mulf %33, %31 : vector<1x100xf32>
    %35 = arith.mulf %30, %30 : vector<1x100xf32>
    %36 = vector.extract_strided_slice %28 {offsets = [2, 0], sizes = [1, 100], strides = [1, 1]} : vector<4x100xf32> to vector<1x100xf32>
    %37 = vector.extract_strided_slice %29 {offsets = [3, 0], sizes = [1, 100], strides = [1, 1]} : vector<4x100xf32> to vector<1x100xf32>
    %cst_11 = arith.constant -2.000000e+00 : f32
    %38 = vector.broadcast %cst_11 : f32 to vector<1x100xf32>
    %39 = arith.mulf %38, %36 : vector<1x100xf32>
    %40 = arith.mulf %39, %37 : vector<1x100xf32>
    %41 = arith.mulf %36, %36 : vector<1x100xf32>
    %42 = arith.addf %34, %40 : vector<1x100xf32>
    %43 = arith.mulf %40, %34 : vector<1x100xf32>
    %44 = arith.addf %35, %43 : vector<1x100xf32>
    %45 = arith.addf %44, %41 : vector<1x100xf32>
    %46 = arith.mulf %40, %35 : vector<1x100xf32>
    %47 = arith.mulf %41, %34 : vector<1x100xf32>
    %48 = arith.addf %46, %47 : vector<1x100xf32>
    %49 = arith.mulf %41, %35 : vector<1x100xf32>
    %50 = vector.extract_strided_slice %5 {offsets = [6, 0], sizes = [4, 100], strides = [1, 1]} : vector<19x100xf32> to vector<4x100xf32>
    %51 = arith.negf %50 : vector<4x100xf32>
    %52 = math.exp %51 : vector<4x100xf32>
    %cst_12 = arith.constant 1.000000e+00 : f32
    %53 = vector.broadcast %cst_12 : f32 to vector<4x100xf32>
    %54 = arith.addf %53, %52 : vector<4x100xf32>
    %55 = arith.divf %53, %54 : vector<4x100xf32>
    %cst_13 = arith.constant 9.900000e-01 : f32
    %56 = vector.broadcast %cst_13 : f32 to vector<4x100xf32>
    %57 = arith.mulf %55, %56 : vector<4x100xf32>
    %58 = math.tanh %50 : vector<4x100xf32>
    %59 = vector.extract_strided_slice %57 {offsets = [0, 0], sizes = [1, 100], strides = [1, 1]} : vector<4x100xf32> to vector<1x100xf32>
    %60 = vector.extract_strided_slice %58 {offsets = [1, 0], sizes = [1, 100], strides = [1, 1]} : vector<4x100xf32> to vector<1x100xf32>
    %cst_14 = arith.constant -2.000000e+00 : f32
    %61 = vector.broadcast %cst_14 : f32 to vector<1x100xf32>
    %62 = arith.mulf %61, %59 : vector<1x100xf32>
    %63 = arith.mulf %62, %60 : vector<1x100xf32>
    %64 = arith.mulf %59, %59 : vector<1x100xf32>
    %65 = vector.extract_strided_slice %57 {offsets = [2, 0], sizes = [1, 100], strides = [1, 1]} : vector<4x100xf32> to vector<1x100xf32>
    %66 = vector.extract_strided_slice %58 {offsets = [3, 0], sizes = [1, 100], strides = [1, 1]} : vector<4x100xf32> to vector<1x100xf32>
    %cst_15 = arith.constant -2.000000e+00 : f32
    %67 = vector.broadcast %cst_15 : f32 to vector<1x100xf32>
    %68 = arith.mulf %67, %65 : vector<1x100xf32>
    %69 = arith.mulf %68, %66 : vector<1x100xf32>
    %70 = arith.mulf %65, %65 : vector<1x100xf32>
    %71 = arith.addf %63, %69 : vector<1x100xf32>
    %72 = arith.mulf %69, %63 : vector<1x100xf32>
    %73 = arith.addf %64, %72 : vector<1x100xf32>
    %74 = arith.addf %73, %70 : vector<1x100xf32>
    %75 = arith.mulf %69, %64 : vector<1x100xf32>
    %76 = arith.mulf %70, %63 : vector<1x100xf32>
    %77 = arith.addf %75, %76 : vector<1x100xf32>
    %78 = arith.mulf %70, %64 : vector<1x100xf32>
    %c0_16 = arith.constant 0 : index
    %c0_17 = arith.constant 0 : index
    %79 = vector.load %arg4[%c0_16, %c0_17] : memref<19x100xf32, #tpu.memory_space<vmem>>, vector<1x100xf32>
    tpu.vector_store %arg4[%c0_16, %c0_17], %16 {strides = array<i32>} : memref<19x100xf32, #tpu.memory_space<vmem>>, vector<1x100xf32>,
    %c1 = arith.constant 1 : index
    %c0_18 = arith.constant 0 : index
    %80 = vector.load %arg4[%c1, %c0_18] : memref<19x100xf32, #tpu.memory_space<vmem>>, vector<1x100xf32>
    tpu.vector_store %arg4[%c1, %c0_18], %19 {strides = array<i32>} : memref<19x100xf32, #tpu.memory_space<vmem>>, vector<1x100xf32>,
    %c2 = arith.constant 2 : index
    %c0_19 = arith.constant 0 : index
    %81 = vector.load %arg4[%c2, %c0_19] : memref<19x100xf32, #tpu.memory_space<vmem>>, vector<1x100xf32>
    tpu.vector_store %arg4[%c2, %c0_19], %20 {strides = array<i32>} : memref<19x100xf32, #tpu.memory_space<vmem>>, vector<1x100xf32>,
    %c3 = arith.constant 3 : index
    %c0_20 = arith.constant 0 : index
    %82 = vector.load %arg4[%c3, %c0_20] : memref<19x100xf32, #tpu.memory_space<vmem>>, vector<1x100xf32>
    tpu.vector_store %arg4[%c3, %c0_20], %42 {strides = array<i32>} : memref<19x100xf32, #tpu.memory_space<vmem>>, vector<1x100xf32>,
    %c4 = arith.constant 4 : index
    %c0_21 = arith.constant 0 : index
    %83 = vector.load %arg4[%c4, %c0_21] : memref<19x100xf32, #tpu.memory_space<vmem>>, vector<1x100xf32>
    tpu.vector_store %arg4[%c4, %c0_21], %45 {strides = array<i32>} : memref<19x100xf32, #tpu.memory_space<vmem>>, vector<1x100xf32>,
    %c5 = arith.constant 5 : index
    %c0_22 = arith.constant 0 : index
    %84 = vector.load %arg4[%c5, %c0_22] : memref<19x100xf32, #tpu.memory_space<vmem>>, vector<1x100xf32>
    tpu.vector_store %arg4[%c5, %c0_22], %48 {strides = array<i32>} : memref<19x100xf32, #tpu.memory_space<vmem>>, vector<1x100xf32>,
    %c6 = arith.constant 6 : index
    %c0_23 = arith.constant 0 : index
    %85 = vector.load %arg4[%c6, %c0_23] : memref<19x100xf32, #tpu.memory_space<vmem>>, vector<1x100xf32>
    tpu.vector_store %arg4[%c6, %c0_23], %49 {strides = array<i32>} : memref<19x100xf32, #tpu.memory_space<vmem>>, vector<1x100xf32>,
    %c7 = arith.constant 7 : index
    %c0_24 = arith.constant 0 : index
    %86 = vector.load %arg4[%c7, %c0_24] : memref<19x100xf32, #tpu.memory_space<vmem>>, vector<1x100xf32>
    tpu.vector_store %arg4[%c7, %c0_24], %71 {strides = array<i32>} : memref<19x100xf32, #tpu.memory_space<vmem>>, vector<1x100xf32>,
    %c8 = arith.constant 8 : index
    %c0_25 = arith.constant 0 : index
    %87 = vector.load %arg4[%c8, %c0_25] : memref<19x100xf32, #tpu.memory_space<vmem>>, vector<1x100xf32>
    tpu.vector_store %arg4[%c8, %c0_25], %74 {strides = array<i32>} : memref<19x100xf32, #tpu.memory_space<vmem>>, vector<1x100xf32>,
    %c9 = arith.constant 9 : index
    %c0_26 = arith.constant 0 : index
    %88 = vector.load %arg4[%c9, %c0_26] : memref<19x100xf32, #tpu.memory_space<vmem>>, vector<1x100xf32>
    tpu.vector_store %arg4[%c9, %c0_26], %77 {strides = array<i32>} : memref<19x100xf32, #tpu.memory_space<vmem>>, vector<1x100xf32>,
    %c10 = arith.constant 10 : index
    %c0_27 = arith.constant 0 : index
    %89 = vector.load %arg4[%c10, %c0_27] : memref<19x100xf32, #tpu.memory_space<vmem>>, vector<1x100xf32>
    tpu.vector_store %arg4[%c10, %c0_27], %78 {strides = array<i32>} : memref<19x100xf32, #tpu.memory_space<vmem>>, vector<1x100xf32>,
    %90 = vector.extract_strided_slice %5 {offsets = [11, 0], sizes = [8, 100], strides = [1, 1]} : vector<19x100xf32> to vector<8x100xf32>
    %c11 = arith.constant 11 : index
    %c0_28 = arith.constant 0 : index
    %91 = vector.load %arg4[%c11, %c0_28] : memref<19x100xf32, #tpu.memory_space<vmem>>, vector<8x100xf32>
    tpu.vector_store %arg4[%c11, %c0_28], %90 {strides = array<i32>} : memref<19x100xf32, #tpu.memory_space<vmem>>, vector<8x100xf32>,
    return
  }
  func.func @transform_0(%arg0: i32) -> (i32, i32) {
    %c0_i32 = arith.constant 0 : i32
    %c0_i32_0 = arith.constant 0 : i32
    return %arg0, %c0_i32 : i32, i32
  }
  func.func @transform_1(%arg0: i32) -> (i32, i32) {
    %c0_i32 = arith.constant 0 : i32
    %c0_i32_0 = arith.constant 0 : i32
    %c0_i32_1 = arith.constant 0 : i32
    return %c0_i32, %c0_i32_0 : i32, i32
  }
  func.func @transform_2(%arg0: i32) -> (i32, i32) {
    %c0_i32 = arith.constant 0 : i32
    %c0_i32_0 = arith.constant 0 : i32
    %c0_i32_1 = arith.constant 0 : i32
    return %c0_i32, %c0_i32_0 : i32, i32
  }
  func.func @transform_3(%arg0: i32) -> (i32, i32) {
    %c0_i32 = arith.constant 0 : i32
    %c0_i32_0 = arith.constant 0 : i32
    return %c0_i32, %arg0 : i32, i32
  }
}

</mosaic_0001>

<bundles_post_ra>
// kernel: tpu_custom_call.1
= control target key start
LH: loop header
LB: loop body
LE: loop exit
PB: predicated region body
PF: predicated region fallthrough
CT: control target
= control target key end

     0   :  { %vm49_vm0 = vcmask 261120   ;;  %v447_v2 = vmov 0.0|0.0   ;;  %vm448_vm2 = vmmov 0   ;;  %v449_v5 = vmov 0.0   ;;  %s590_s0 = inlined_call_operand.vmem [shape: f32[100,32], index: 0, kind: input, shape index: {}]   ;;  %s591_s1 = inlined_call_operand.vmem [shape: f32[19,32], index: 1, kind: input, shape index: {}]   ;;  %s592_s2 = inlined_call_operand.vmem [shape: f32[19,1], index: 2, kind: input, shape index: {}]   ;;  %s593_s3 = inlined_call_operand.hbm [shape: f32[19,100], index: 3, kind: output, shape index: {}]  }
   0x1   :  { %v18_v0 = vld [vmem:[%s590_s0] sm:$0xff]  ;;  %v19_v1 = vld [vmem:[%s590_s0 + $0x8] sm:$0xff]  ;;  %358 = vmatprep.subr.bf16.mxu0 %v447_v2  ;;  %382 = vmatprep.subr.bf16.mxu1 %v447_v2  ;;  %vm482_vm1 = vmpackc.low %vm49_vm0, %vm49_vm0  ;;  %v450_v8 = vmov 0  }
   0x2   :  { %v359_v3 = vpack.c.bf16 %v19_v1, %v18_v0  ;;  %349 = vmatprep.mubr.msk.f32.mxu0 %vm448_vm2, %v449_v5  ;;  %352 = vmatprep.mubr.msk.f32.mxu1 %vm448_vm2, %v449_v5  ;;  %v20_v6 = vld [vmem:[%s590_s0 + $0x10] sm:$0xff]  ;;  %v21_v7 = vld [vmem:[%s590_s0 + $0x18] sm:$0xff]  ;;  %v31_v9 = vld [vmem:[%s592_s2] sm:$0xff] }
   0x3   :  { %403 = vset.pattern.permute.xlu0 %v450_v8  ;;  %404 = vset.pattern.permute.xlu1 %v450_v8  ;;  %v33_v10 = vld [vmem:[%s592_s2 + $0x10] sm:$0x7] }
   0x4   :  { %361 = vmatpush3.bf16.xpose.msk.msra.mxu0 %vm482_vm1, %v359_v3  ;;  %389 = vmatpush3.bf16.xpose.msk.msra.mxu1 %vm482_vm1, %v359_v3 }
   0x5   :  { %362 = vmatprep.subr.bf16.mxu0 %v447_v2  ;;  %383 = vmatprep.subr.bf16.mxu1 %v447_v2 }
   0x6   :  { %36 = vperm.xlu0 %403, %v31_v9  }
   0x7   :  { %8 = vsyncpa [#allocation3], 0  ;;  %v363_v11 = vpack.c.bf16 %v21_v7, %v20_v6  ;;  %v32_v12 = vld [vmem:[%s592_s2 + $0x8] sm:$0xff]  ;;  %46 = vperm.xlu1 %404, %v33_v10   ;;  %v22_v13 = vld [vmem:[%s590_s0 + $0x20] sm:$0xff]  ;;  %vm269_vm3 = vcmask 818179   ;;  %vm271_vm4 = vcmask 813056  }
   0x8   :  { %v23_v14 = vld [vmem:[%s590_s0 + $0x28] sm:$0xff]  ;;  %v24_v16 = vld [vmem:[%s590_s0 + $0x30] sm:$0xff]  ;;  %v25_v17 = vld [vmem:[%s590_s0 + $0x38] sm:$0xff]  ;;  %vm254_vm5 = vcmask 816133   ;;  %vm256_vm6 = vcmask 813058   ;;  %vm258_vm7 = vcmask 812033  }
   0x9   :  { %v367_v15 = vpack.c.bf16 %v23_v14, %v22_v13  ;;  %v371_v18 = vpack.c.bf16 %v25_v17, %v24_v16  ;;  %v26_v19 = vld [vmem:[%s590_s0 + $0x40] sm:$0xff]  ;;  %v27_v20 = vld [vmem:[%s590_s0 + $0x48] sm:$0xff]  ;;  %v28_v22 = vld [vmem:[%s590_s0 + $0x50] sm:$0xff]  ;;  %vm252_vm8 = vcmask 811008   ;;  %vm261_vm9 = vcmask 814083  }
   0xa   :  { %41 = vperm.xlu0 %403, %v32_v12   ;;  %v375_v21 = vpack.c.bf16 %v27_v20, %v26_v19  ;;  %v29_v23 = vld [vmem:[%s590_s0 + $0x58] sm:$0xff]  ;;  %v30_v25 = vld [vmem:[%s590_s0 + $0x60] sm:$0xf]  ;;  %v16_v27 = vld [vmem:[%s591_s1 + $0x8] sm:$0xff]  ;;  %vm264_vm10 = vcmask 817158  }
   0xb   :  { %v379_v24 = vpack.c.bf16 %v29_v23, %v28_v22  ;;  %v15_v26 = vld [vmem:[%s591_s1] sm:$0xff]  ;;  %v17_v28 = vld [vmem:[%s591_s1 + $0x10] sm:$0x7]  ;;  %s451_s1 = smov [#allocation2]  }
   0xc   :  { %365 = vmatpush3.bf16.xpose.msk.msra.mxu0 %vm482_vm1, %v363_v11  ;;  %390 = vmatpush3.bf16.xpose.msk.msra.mxu1 %vm482_vm1, %v363_v11  ;;  %s278_s21 = sshll.u32 %s451_s1, 4  ;;  %s279_s21 = int_to_ptr.vmem [resolvable:$true] %s278_s21 }
   0xd   :  { %366 = vmatprep.subr.bf16.mxu0 %v447_v2  ;;  %384 = vmatprep.subr.bf16.mxu1 %v447_v2  ;;  %s423_s22 = scalar_lea.vmem %s279_s21, 384  ;;  %p428_p1 = scmp.lt.s32.totalorder %s279_s21, %s279_s21 }
   0xe   :  { %p424_p0 = scmp.ne.s32.totalorder %s279_s21, %s423_s22  ;;  %p429_p2 = scmp.lt.s32.totalorder %s423_s22, %s423_s22 }
  0x10   :  { %p430_p3 = por %p429_p2, %p428_p1 }
  0x12   :  { %p431_p4 = pnand %p430_p3, %p424_p0 }
  0x14   :  { %369 = vmatpush3.bf16.xpose.msk.msra.mxu0 %vm482_vm1, %v367_v15  ;;  %391 = vmatpush3.bf16.xpose.msk.msra.mxu1 %vm482_vm1, %v367_v15 }
  0x15   :  { %370 = vmatprep.subr.bf16.mxu0 %v447_v2  ;;  %385 = vmatprep.subr.bf16.mxu1 %v447_v2 }
  0x1c   :  { %373 = vmatpush3.bf16.xpose.msk.msra.mxu0 %vm482_vm1, %v371_v18  ;;  %392 = vmatpush3.bf16.xpose.msk.msra.mxu1 %vm482_vm1, %v371_v18 }
  0x1d   :  { %374 = vmatprep.subr.bf16.mxu0 %v447_v2  ;;  %386 = vmatprep.subr.bf16.mxu1 %v447_v2 }
  0x24   :  { %377 = vmatpush3.bf16.xpose.msk.msra.mxu0 %vm482_vm1, %v375_v21  ;;  %393 = vmatpush3.bf16.xpose.msk.msra.mxu1 %vm482_vm1, %v375_v21 }
  0x25   :  { %378 = vmatprep.subr.bf16.mxu0 %v447_v2  ;;  %387 = vmatprep.subr.bf16.mxu1 %v447_v2 }
  0x2c   :  { %381 = vmatpush3.bf16.xpose.msk.msra.mxu0 %vm482_vm1, %v379_v24  ;;  %394 = vmatpush3.bf16.xpose.msk.msra.mxu1 %vm482_vm1, %v379_v24 }
  0x2d   :  { %347 = vmatprep.subr.mxu0 %v449_v5  ;;  %388 = vmatprep.subr.mxu1 %v449_v5 }
  0x34   :  { %348 = vmatpush3.xpose.msk.msra.mxu0 %vm49_vm0, %v30_v25  ;;  %395 = vmatpush3.xpose.msk.msra.mxu1 %vm49_vm0, %v30_v25 }
  0x37   :  { %350 = vmatmul.mubr.msk.f32.vlgmr.msra.gmra.mrb[0].mxu0 %vm49_vm0, %v15_v26  ;;  %353 = vmatmul.mubr.msk.f32.vlgmr.msra.gmra.mrb[0].mxu1 %vm49_vm0, %v16_v27 }
  0x38   :  { %355 = vmatprep.mubr.msk.f32.mxu1 %vm448_vm2, %v449_v5 }
  0x3b   :  { %356 = vmatmul.mubr.msk.f32.gmra.mrb[2].mxu1 %vm49_vm0, %v17_v28 }
  0x85   :  { %v37_v29 = vpop.permute.xlu0 %36 }
  0x86   :  { %v47_v37 = vpop.permute.xlu1 %46 }
  0x89   :  { %v42_v30 = vpop.permute.xlu0 %41 }
 0x10a   :  { %v164_v31 = vpop.f32.mrb[0].mxu0  ;;  %v169_v32 = vpop.f32.mrb[0].mxu1 }
 0x10b   :  { %v165_v33 = vadd.f32 %v164_v31, %v37_v29  ;;  %v170_v34 = vadd.f32 %v169_v32, %v42_v30  ;;  %v351_v35 = vpop.f32.mrb[1].mxu0  ;;  %v354_v36 = vpop.f32.mrb[1].mxu1 }
 0x10d   :  { %v305_v38 = vmul.f32 -1.442695, %v165_v33  ;;  %v188_v39 = vmul.f32 1.442695, %v165_v33  ;;  %v190_v40 = vmul.f32 1.442695, %v170_v34 }
 0x10e   :  { %270 = vst.msk [vmem:[#allocation2 + $0x8] sm:$0xf8] %vm269_vm3, %v170_v34  ;;  %v306_v41 = vmul.f32 -1.442695, %v170_v34  ;;  %v174_v42 = vpop.f32.mrb[2].mxu1 }
 0x10f   :  { %405 = vpow2.f32 %v305_v38  ;;  %v175_v43 = vadd.f32 %v174_v42, %v47_v37  ;;  %v357_v44 = vpop.f32.mrb[3].mxu1 }
 0x110   :  { %407 = vpow2.f32 %v188_v39 }
 0x111   :  { %409 = vpow2.f32 %v190_v40  ;;  %272 = vst.msk [vmem:[#allocation2 + $0x10] sm:$0x7] %vm271_vm4, %v175_v43 }
 0x112   :  { %411 = vpow2.f32 %v306_v41 }
 0x113   :  { %413 = vtanh.f32 %v165_v33 }
 0x119   :  { %v406_v45 = vpop.eup %405 }
 0x11a   :  { %v408_v46 = vpop.eup %407  ;;  %v181_v47 = vadd.f32 1.0, %v406_v45 }
 0x11b   :  { %v410_v48 = vpop.eup %409  ;;  %255 = vst.msk [vmem:[#allocation2 - $0x4] sm:$0x20] %vm254_vm5, %v408_v46 }
 0x11c   :  { %v412_v49 = vpop.eup %411  ;;  %415 = vrcp.f32 %v181_v47  ;;  %257 = vst.msk [vmem:[#allocation2] sm:$0x4] %vm256_vm6, %v410_v48 }
 0x11d   :  { %v224_v50 = vadd.f32 1.0, %v412_v49  ;;  %417 = vtanh.f32 %v170_v34  ;;  %v414_v51 = vpop.eup %413 }
 0x11e   :  { %v196_v59 = vrot.slane %v414_v51, 1 }
 0x11f   :  { %419 = vrcp.f32 %v224_v50 }
 0x126   :  { %v416_v52 = vpop.eup %415 }
 0x127   :  { %v184_v53 = vmul.f32 2.5257287, %v416_v52  ;;  %v192_v54 = vmul.f32 0.99, %v416_v52  ;;  %v418_v55 = vpop.eup %417 }
 0x128   :  { %v231_v2 = vrot.slane %v418_v55, 1 }
 0x129   :  { %v420_v56 = vpop.eup %419  ;;  %v185_v57 = vadd.f32 4.3820267, %v184_v53  ;;  %v194_v58 = vmul.f32 -2.0, %v192_v54  ;;  %v199_v60 = vmul.f32 %v192_v54, %v192_v54 }
 0x12a   :  { %v227_v61 = vmul.f32 0.99, %v420_v56 }
 0x12b   :  { %v186_v62 = vmul.f32 1.442695, %v185_v57  ;;  %v198_v63 = vmul.f32 %v196_v59, %v194_v58  ;;  %v215_v0 = vrot.slane %v199_v60, 6  ;;  %v212_v22 = vrot.slane %v199_v60, 2 }
 0x12c   :  { %v229_v1 = vmul.f32 -2.0, %v227_v61  ;;  %v234_v3 = vmul.f32 %v227_v61, %v227_v61 }
 0x12d   :  { %421 = vpow2.f32 %v186_v62  ;;  %v201_v4 = vrot.slane %v198_v63, 2  ;;  %v204_v5 = vrot.slane %v198_v63, 6  ;;  %v217_v6 = vmul.f32 %v215_v0, %v198_v63 }
 0x12e   :  { %v220_v7 = vmul.f32 %v215_v0, %v199_v60  ;;  %v233_v8 = vmul.f32 %v231_v2, %v229_v1  ;;  %v251_v9 = vmul.f32 %v234_v3, %v215_v0  ;;  %v245_v25 = vrot.slane %v234_v3, 2 }
 0x12f   :  { %v203_v10 = vadd.f32 %v201_v4, %v198_v63  ;;  %v206_v11 = vmul.f32 %v204_v5, %v198_v63  ;;  %v218_v12 = vmul.f32 %v204_v5, %v199_v60  ;;  %v249_v13 = vmul.f32 %v234_v3, %v204_v5 }
 0x130   :  { %v236_v14 = vrot.slane %v233_v8, 2  ;;  %v239_v15 = vmul.f32 %v233_v8, %v204_v5  ;;  %v248_v16 = vmul.f32 %v233_v8, %v215_v0  ;;  %263 = vst.msk [vmem:[#allocation2 + $0x3] sm:$0x8] %vm261_vm9, %v220_v7 }
 0x131   :  { %268 = vst.msk [vmem:[#allocation2 + $0xa] sm:$0x1] %vm252_vm8, %v251_v9  ;;  %v208_v17 = vrot.slane %v206_v11, 2  ;;  %v219_v18 = vadd.f32 %v218_v12, %v217_v6 }
 0x132   :  { %259 = vst.msk [vmem:[#allocation2 + $0x2] sm:$0x2] %vm258_vm7, %v203_v10  ;;  %v238_v19 = vadd.f32 %v236_v14, %v198_v63  ;;  %v241_v20 = vrot.slane %v239_v15, 2  ;;  %v250_v21 = vadd.f32 %v249_v13, %v248_v16 }
 0x133   :  { %v210_v23 = vadd.f32 %v208_v17, %v199_v60  ;;  %262 = vst.msk [vmem:[#allocation2 + $0x2] sm:$0x8] %vm261_vm9, %v219_v18 }
 0x134   :  { %v243_v24 = vadd.f32 %v241_v20, %v199_v60  ;;  %265 = vst.msk [vmem:[#allocation2 + $0x1] sm:$0x40] %vm264_vm10, %v238_v19 }
 0x135   :  { %267 = vst.msk [vmem:[#allocation2 + $0x9] sm:$0x1] %vm252_vm8, %v250_v21  ;;  %v214_v26 = vadd.f32 %v212_v22, %v210_v23 }
 0x136   :  { %v247_v27 = vadd.f32 %v245_v25, %v243_v24 }
 0x137   :  { %v422_v28 = vpop.eup %421  ;;  %260 = vst.msk [vmem:[#allocation2 + $0x3] sm:$0x2] %vm258_vm7, %v214_v26 }
 0x138   :  { %253 = vst.msk [vmem:[#allocation2] sm:$0x1] %vm252_vm8, %v422_v28 }
 0x139   :  { %266 = vst.msk [vmem:[#allocation2 + $0x2] sm:$0x40] %vm264_vm10, %v247_v27 }
 0x13a   :  { %434 = shalt.err (!%p431_p4)
}
 0x13b   :  { %s435_s25 = scalar_lea.hbm %s593_s3, 384 }
 0x13c   :  { %p436_p5 = scmp.ne.s32.totalorder %s593_s3, %s435_s25  ;;  %p439_p6 = scmp.lt.u32.totalorder %s435_s25, %s593_s3 }
 0x13e   :  { %p441_p7 = pnand %p439_p6, %p436_p5 }
 0x140   :  { %444 = shalt.err (!%p441_p7)
}
 0x141   :  { %s452_s2 = smov 128   ;;  %s453_s30 = smov 8  }
 0x142   :  { %284 = dma.vmem_to_hbm [thread:$0]  %s279_s21, 384, %s593_s3, [#allocation3], %s452_s2, %s452_s2, %s453_s30  }
 0x143   :  { %445 = dma.done.wait [#allocation3], 384  }
 0x144   :  { %446 = vsyncadd [#allocation3], 4294966912 }
 0x145   :  { %288 = vsyncpa [#allocation3], 1 }

</bundles_post_ra>
